<compile_context>
chip_gen: v6e
topology: v6e:2x2x1
jax: 0.10.0
libtpu: 0.0.40
codegen_flags: <defaults>
</compile_context>

<pallas_src>
import jax
import jax.numpy as jnp
from jax.experimental import pallas as pl
from jax.experimental.pallas import tpu as pltpu


# Below this many bytes a copy is pure launch/DMA-issue overhead -> alias instead.
_MIN_COPY_BYTES = 1 << 20          # 1 MiB
# Above this many bytes a tensor's copy is split into multiple concurrent DMAs.
_CHUNK_BYTES = 32 << 20            # 32 MiB
_MAX_CHUNKS_PER_TENSOR = 4


def _padded_hbm_bytes(t):
    """Approximate bytes actually resident in HBM for a tiled TPU layout:
    last dim padded to 128 lanes, second-last to the (8 * packing) sublane
    tile for the dtype.  Used only for pl.CostEstimate."""
    itemsize = t.dtype.itemsize
    if t.ndim == 0:
        return itemsize
    if t.ndim == 1:
        lanes = -(-t.shape[0] // 128) * 128
        return max(lanes, 128) * itemsize
    packing = max(1, 4 // max(1, itemsize))
    sublane_tile = 8 * packing
    lead = 1
    for d in t.shape[:-2]:
        lead *= int(d)
    sl = -(-t.shape[-2] // sublane_tile) * sublane_tile
    ln = -(-t.shape[-1] // 128) * 128
    return lead * sl * ln * itemsize


def _make_chunk_plan(t, chunk_bytes):
    """Static list of (offset, size) slices along the leading axis."""
    nbytes = int(t.size) * t.dtype.itemsize
    if t.ndim == 0 or nbytes < chunk_bytes or t.shape[0] < 2:
        return ((0, -1),)  # sentinel: copy the whole ref, no slicing
    lead = int(t.shape[0])
    n = min(_MAX_CHUNKS_PER_TENSOR, lead)
    base, rem = divmod(lead, n)
    plan, off = [], 0
    for c in range(n):
        sz = base + (1 if c < rem else 0)
        if sz > 0:
            plan.append((off, sz))
            off += sz
    return tuple(plan)


def _make_copy_kernel(chunk_plans):
    """Build a kernel copying k tensors HBM->HBM with overlapped async DMAs.

    refs = (in_0..in_{k-1}, out_0..out_{k-1}, dma_sem[n_chunks]).
    All starts are issued before any wait (full overlap; no pl.delay /
    barriers — on v5e the copies are HBM-BW bound and any serialization of
    starts lengthens the tail)."""
    k = len(chunk_plans)
    n_sems = sum(len(p) for p in chunk_plans)

    def kernel(*refs):
        ins = refs[:k]
        outs = refs[k:2 * k]
        sem = refs[2 * k]
        copies = []
        s = 0
        for i, plan in enumerate(chunk_plans):
            if len(plan) == 1 and plan[0][1] == -1:
                cp = pltpu.make_async_copy(ins[i], outs[i], sem.at[s])
                cp.start()
                copies.append(cp)
                s += 1
            else:
                for (off, sz) in plan:
                    cp = pltpu.make_async_copy(
                        ins[i].at[pl.ds(off, sz)],
                        outs[i].at[pl.ds(off, sz)],
                        sem.at[s],
                    )
                    cp.start()
                    copies.append(cp)
                    s += 1
        for cp in copies:
            cp.wait()

    return kernel, n_sems


def _multi_copy(tensors, *, min_copy_bytes=_MIN_COPY_BYTES, chunk_bytes=_CHUNK_BYTES):
    """Return copies of `tensors` (heterogeneous shapes/dtypes allowed).

    Tensors smaller than `min_copy_bytes` are returned as-is (JAX arrays are
    immutable, so aliasing is always safe); the rest are copied by a single
    Pallas kernel issuing overlapped, possibly chunked, HBM->HBM DMAs."""
    tensors = [jnp.asarray(t) for t in tensors]
    if len(tensors) == 0:
        return []

    nbytes = [int(t.size) * t.dtype.itemsize for t in tensors]
    kernel_idx = [i for i, b in enumerate(nbytes) if b > 0 and b >= min_copy_bytes]
    results = list(tensors)  # passthrough/alias by default
    if not kernel_idx:
        return results

    sel = [tensors[i] for i in kernel_idx]
    chunk_plans = tuple(_make_chunk_plan(t, chunk_bytes) for t in sel)
    kernel, n_sems = _make_copy_kernel(chunk_plans)

    out_shapes = [jax.ShapeDtypeStruct(t.shape, t.dtype) for t in sel]
    total_padded = sum(_padded_hbm_bytes(t) for t in sel)

    copied = pl.pallas_call(
        kernel,
        out_shape=out_shapes,
        in_specs=[pl.BlockSpec(memory_space=pl.ANY)] * len(sel),
        out_specs=[pl.BlockSpec(memory_space=pl.ANY)] * len(sel),
        scratch_shapes=[pltpu.SemaphoreType.DMA((n_sems,))],
        cost_estimate=pl.CostEstimate(
            flops=0, transcendentals=0, bytes_accessed=2 * total_padded
        ),
    )(*sel)
    if not isinstance(copied, (list, tuple)):
        copied = [copied]

    for pos, c in zip(kernel_idx, copied):
        results[pos] = c
    return results


class MultiSelect:
    """JAX/Pallas re-implementation of boardom MultiSelect.

    No parameters.  `indices_or_keys` selects a subset of `outputs`:
      - outputs is a list/tuple  -> returns [outputs[i] for i in indices]
      - outputs is a dict        -> returns {key: outputs[key]} for the
        selected keys (keys given directly, or positionally by int index).

    Default (`copy=False`) returns the selected arrays directly — zero data
    movement, identical to the PyTorch reference (which returns aliases).
    With `copy=True`, selected tensors above `min_copy_bytes` are copied by a
    single Pallas HBM->HBM DMA kernel (chunked for very large tensors).
    """

    def __init__(self, indices_or_keys=(0,), *, copy=False,
                 min_copy_bytes=_MIN_COPY_BYTES, chunk_bytes=_CHUNK_BYTES):
        self.indices_or_keys = list(indices_or_keys)
        self.copy = copy
        self.min_copy_bytes = min_copy_bytes
        self.chunk_bytes = chunk_bytes

    def _maybe_copy(self, selected):
        if not self.copy:
            return list(selected)
        return _multi_copy(selected, min_copy_bytes=self.min_copy_bytes,
                           chunk_bytes=self.chunk_bytes)

    def __call__(self, outputs):
        if len(self.indices_or_keys) == 0:
            return {} if isinstance(outputs, dict) else []
        if isinstance(outputs, dict):
            if isinstance(self.indices_or_keys[0], int):
                out_keys = list(outputs.keys())
                keys = [out_keys[i] for i in self.indices_or_keys]
            else:
                keys = list(self.indices_or_keys)
            selected = self._maybe_copy([outputs[key] for key in keys])
            return {key: v for key, v in zip(keys, selected)}
        else:
            return self._maybe_copy([outputs[i] for i in self.indices_or_keys])


if __name__ == "__main__":
    key = jax.random.PRNGKey(0)

    # Candidate outputs: 5 tensors, each NCHW (B=2, C=4, H=16, W=16).
    n_outputs = 5
    shape = (2, 4, 16, 16)
    keys = jax.random.split(key, n_outputs)
    outputs = [jax.random.normal(k, shape, dtype=jnp.float32) for k in keys]

    # --- list case, default path: pure selection, aliases (matches PyTorch) ---
    module = MultiSelect(indices_or_keys=[0, 2, 3])
    selected = module(outputs)
    assert len(selected) == 3
    for got, want_idx in zip(selected, [0, 2, 3]):
        assert got is outputs[want_idx]          # aliased, zero data movement
        assert jnp.array_equal(got, outputs[want_idx])

    # --- dict case (positional int indices into dict keys), alias path ---
    out_dict = {f"feat{i}": t for i, t in enumerate(outputs)}
    module_d = MultiSelect(indices_or_keys=[1, 4])
    selected_d = module_d(out_dict)
    assert list(selected_d.keys()) == ["feat1", "feat4"]
    assert selected_d["feat1"] is outputs[1]
    assert selected_d["feat4"] is outputs[4]

    # --- dict case (string keys), alias path ---
    module_k = MultiSelect(indices_or_keys=["feat3", "feat0"])
    selected_k = module_k(out_dict)
    assert jnp.array_equal(selected_k["feat3"], outputs[3])
    assert jnp.array_equal(selected_k["feat0"], outputs[0])

    # --- empty selection (degenerate case guarded in wrapper) ---
    assert MultiSelect(indices_or_keys=[])(outputs) == []
    assert MultiSelect(indices_or_keys=[], copy=True)(out_dict) == {}

    # --- explicit copy path: force the Pallas DMA kernel even for small tensors ---
    module_c = MultiSelect(indices_or_keys=[0, 2, 3], copy=True, min_copy_bytes=0)
    selected_c = jax.block_until_ready(module_c(outputs))
    assert len(selected_c) == 3
    for got, want_idx in zip(selected_c, [0, 2, 3]):
        assert got.shape == shape and got.dtype == jnp.float32
        assert jnp.array_equal(got, outputs[want_idx])

    # --- copy path with heterogeneous shapes/dtypes + chunked DMAs ---
    hetero = [
        jax.random.normal(keys[0], (2, 4, 16, 16), dtype=jnp.float32),
        jax.random.normal(keys[1], (2, 8, 8, 32), dtype=jnp.bfloat16),
        jax.random.normal(keys[2], (32, 128), dtype=jnp.float32),  # 16 KiB
    ]
    # chunk_bytes=4096 -> the (32,128) f32 tensor is split into 4 concurrent DMAs.
    module_h = MultiSelect(indices_or_keys=[2, 0, 1], copy=True,
                           min_copy_bytes=0, chunk_bytes=4096)
    selected_h = jax.block_until_ready(module_h(hetero))
    assert selected_h[0].shape == (32, 128) and selected_h[0].dtype == jnp.float32
    assert selected_h[1].shape == (2, 4, 16, 16)
    assert selected_h[2].shape == (2, 8, 8, 32) and selected_h[2].dtype == jnp.bfloat16
    assert jnp.array_equal(selected_h[0], hetero[2])
    assert jnp.array_equal(selected_h[1], hetero[0])
    assert jnp.array_equal(selected_h[2], hetero[1])

    # --- copy=True but below threshold: kernel is skipped, aliases returned ---
    module_t = MultiSelect(indices_or_keys=[1], copy=True)   # 8 KiB << 1 MiB
    (small,) = module_t(outputs)
    assert small is outputs[1]

    print("KERNEL_OK")
</pallas_src>

<mosaic_0001>
module attributes {stable_mosaic.version = 11 : i64} {
  func.func @kernel(%arg0: memref<2x4x16x16xf32, #tpu.memory_space<any>>, %arg1: memref<2x4x16x16xf32, #tpu.memory_space<any>>, %arg2: memref<2x4x16x16xf32, #tpu.memory_space<any>>, %arg3: memref<2x4x16x16xf32, #tpu.memory_space<any>>, %arg4: memref<2x4x16x16xf32, #tpu.memory_space<any>>, %arg5: memref<2x4x16x16xf32, #tpu.memory_space<any>>, %arg6: memref<3x!tpu.dma_semaphore, #tpu.memory_space<semaphore_mem>>) attributes {dimension_semantics = [], scalar_prefetch = 0 : i64, scratch_operands = 1 : i64, tpu.core_type = #tpu.core_type<tc>} {
    %c0_i32 = arith.constant 0 : i32
    %0 = tpu.memref_slice %arg6[%c0_i32] : memref<3x!tpu.dma_semaphore, #tpu.memory_space<semaphore_mem>> -> memref<1x!tpu.dma_semaphore, #tpu.memory_space<semaphore_mem>>
    %1 = tpu.memref_squeeze %0 : memref<1x!tpu.dma_semaphore, #tpu.memory_space<semaphore_mem>> -> memref<!tpu.dma_semaphore, #tpu.memory_space<semaphore_mem>>
    tpu.enqueue_dma source(%arg0 : memref<2x4x16x16xf32, #tpu.memory_space<any>>) target(%arg3 : memref<2x4x16x16xf32, #tpu.memory_space<any>>) target_semaphore(%1 : memref<!tpu.dma_semaphore, #tpu.memory_space<semaphore_mem>>)
    %c1_i32 = arith.constant 1 : i32
    %2 = tpu.memref_slice %arg6[%c1_i32] : memref<3x!tpu.dma_semaphore, #tpu.memory_space<semaphore_mem>> -> memref<1x!tpu.dma_semaphore, #tpu.memory_space<semaphore_mem>>
    %3 = tpu.memref_squeeze %2 : memref<1x!tpu.dma_semaphore, #tpu.memory_space<semaphore_mem>> -> memref<!tpu.dma_semaphore, #tpu.memory_space<semaphore_mem>>
    tpu.enqueue_dma source(%arg1 : memref<2x4x16x16xf32, #tpu.memory_space<any>>) target(%arg4 : memref<2x4x16x16xf32, #tpu.memory_space<any>>) target_semaphore(%3 : memref<!tpu.dma_semaphore, #tpu.memory_space<semaphore_mem>>)
    %c2_i32 = arith.constant 2 : i32
    %4 = tpu.memref_slice %arg6[%c2_i32] : memref<3x!tpu.dma_semaphore, #tpu.memory_space<semaphore_mem>> -> memref<1x!tpu.dma_semaphore, #tpu.memory_space<semaphore_mem>>
    %5 = tpu.memref_squeeze %4 : memref<1x!tpu.dma_semaphore, #tpu.memory_space<semaphore_mem>> -> memref<!tpu.dma_semaphore, #tpu.memory_space<semaphore_mem>>
    tpu.enqueue_dma source(%arg2 : memref<2x4x16x16xf32, #tpu.memory_space<any>>) target(%arg5 : memref<2x4x16x16xf32, #tpu.memory_space<any>>) target_semaphore(%5 : memref<!tpu.dma_semaphore, #tpu.memory_space<semaphore_mem>>)
    %c0_i32_0 = arith.constant 0 : i32
    %6 = tpu.memref_slice %arg6[%c0_i32_0] : memref<3x!tpu.dma_semaphore, #tpu.memory_space<semaphore_mem>> -> memref<1x!tpu.dma_semaphore, #tpu.memory_space<semaphore_mem>>
    %7 = tpu.memref_squeeze %6 : memref<1x!tpu.dma_semaphore, #tpu.memory_space<semaphore_mem>> -> memref<!tpu.dma_semaphore, #tpu.memory_space<semaphore_mem>>
    tpu.wait_dma2 semaphore(%7 : memref<!tpu.dma_semaphore, #tpu.memory_space<semaphore_mem>>) src(%arg0 : memref<2x4x16x16xf32, #tpu.memory_space<any>>) dst(%arg3 : memref<2x4x16x16xf32, #tpu.memory_space<any>>)
    %c1_i32_1 = arith.constant 1 : i32
    %8 = tpu.memref_slice %arg6[%c1_i32_1] : memref<3x!tpu.dma_semaphore, #tpu.memory_space<semaphore_mem>> -> memref<1x!tpu.dma_semaphore, #tpu.memory_space<semaphore_mem>>
    %9 = tpu.memref_squeeze %8 : memref<1x!tpu.dma_semaphore, #tpu.memory_space<semaphore_mem>> -> memref<!tpu.dma_semaphore, #tpu.memory_space<semaphore_mem>>
    tpu.wait_dma2 semaphore(%9 : memref<!tpu.dma_semaphore, #tpu.memory_space<semaphore_mem>>) src(%arg1 : memref<2x4x16x16xf32, #tpu.memory_space<any>>) dst(%arg4 : memref<2x4x16x16xf32, #tpu.memory_space<any>>)
    %c2_i32_2 = arith.constant 2 : i32
    %10 = tpu.memref_slice %arg6[%c2_i32_2] : memref<3x!tpu.dma_semaphore, #tpu.memory_space<semaphore_mem>> -> memref<1x!tpu.dma_semaphore, #tpu.memory_space<semaphore_mem>>
    %11 = tpu.memref_squeeze %10 : memref<1x!tpu.dma_semaphore, #tpu.memory_space<semaphore_mem>> -> memref<!tpu.dma_semaphore, #tpu.memory_space<semaphore_mem>>
    tpu.wait_dma2 semaphore(%11 : memref<!tpu.dma_semaphore, #tpu.memory_space<semaphore_mem>>) src(%arg2 : memref<2x4x16x16xf32, #tpu.memory_space<any>>) dst(%arg5 : memref<2x4x16x16xf32, #tpu.memory_space<any>>)
    return
  }
}

</mosaic_0001>

<bundles_post_ra>
// kernel: tpu_custom_call.1
= control target key start
LH: loop header
LB: loop body
LE: loop exit
PB: predicated region body
PF: predicated region fallthrough
CT: control target
= control target key end

     0   :  { %s77_s18 = smov [#allocation2]   ;;  %s78_s19 = smov 131072   ;;  %s130_s0 = inlined_call_operand.hbm [shape: f32[2,4,16,16], index: 0, kind: input, shape index: {}]   ;;  %s131_s3 = inlined_call_operand.hbm [shape: f32[2,4,16,16], index: 3, kind: output, shape index: {0}]   ;;  %s132_s1 = inlined_call_operand.hbm [shape: f32[2,4,16,16], index: 1, kind: input, shape index: {}]   ;;  %s133_s4 = inlined_call_operand.hbm [shape: f32[2,4,16,16], index: 4, kind: output, shape index: {1}]   ;;  %s134_s2 = inlined_call_operand.hbm [shape: f32[2,4,16,16], index: 2, kind: input, shape index: {}]   ;;  %s135_s5 = inlined_call_operand.hbm [shape: f32[2,4,16,16], index: 5, kind: output, shape index: {2}]  }
   0x1   :  { %s79_s20 = smov 0   ;;  %s80_s25 = smov [#allocation2 + $0x1]  }
   0x2   :  { %17 = dma.general %s130_s0, 2048, %s131_s3, %s77_s18, %s78_s19, [#allocation4], %s79_s20, 0  }
   0x3   :  { %25 = dma.general %s132_s1, 2048, %s133_s4, %s80_s25, %s78_s19, [#allocation6], %s79_s20, 0  }
   0x4   :  { %s81_s30 = smov [#allocation2 + $0x2]  }
   0x5   :  { %33 = dma.general %s134_s2, 2048, %s135_s5, %s81_s30, %s78_s19, [#allocation8], %s79_s20, 0  }
   0x6   :  { %71 = dma.done.wait [#allocation2], 2048 }
   0x7   :  { %72 = vsyncadd [#allocation2], 4294965248 }
   0x8   :  { %73 = dma.done.wait [#allocation2 + $0x1], 2048 }
   0x9   :  { %74 = vsyncadd [#allocation2 + $0x1], 4294965248 }
   0xa   :  { %75 = dma.done.wait [#allocation2 + $0x2], 2048 }
   0xb   :  { %76 = vsyncadd [#allocation2 + $0x2], 4294965248 }
   0xc   :  { %43 = vsyncmov [#allocation2] }
   0xf   :  { %s44_s0 = vpop.sfrf %43 }
  0x10   :  { %p63_p0 = scmp.ne.s32.totalorder %s44_s0, 0 }
  0x12   :  { %48 = shalt.err (%p63_p0)  }
  0x13   :  { %50 = vsyncmov [#allocation2 + $0x1] }
  0x16   :  { %s51_s1 = vpop.sfrf %50 }
  0x17   :  { %p64_p1 = scmp.ne.s32.totalorder %s51_s1, 0 }
  0x19   :  { %55 = shalt.err (%p64_p1)  }
  0x1a   :  { %57 = vsyncmov [#allocation2 + $0x2] }
  0x1d   :  { %s58_s3 = vpop.sfrf %57 }
  0x1e   :  { %p65_p2 = scmp.ne.s32.totalorder %s58_s3, 0 }
  0x20   :  { %62 = shalt.err (%p65_p2)  }

</bundles_post_ra>
